<compile_context>
chip_gen: v6e
topology: v6e:2x2x1
jax: 0.10.0
libtpu: 0.0.40
codegen_flags: <defaults>
</compile_context>

<pallas_src>
import math
from typing import NamedTuple

import jax
import jax.numpy as jnp
from jax.experimental import pallas as pl
from jax.experimental.pallas import tpu as pltpu

_GELU_C = math.sqrt(2.0 / math.pi)
_MIB = 1024 * 1024


def _round_up(x, m):
    return ((x + m - 1) // m) * m


def _cdiv(a, b):
    return (a + b - 1) // b


def _tpu_vmem_bytes():
    try:
        info = pltpu.get_tpu_info()
        cap = getattr(info, "vmem_capacity_bytes", None)
        if cap:
            return int(cap)
    except Exception:
        pass
    return 64 * _MIB  # conservative fallback (v7x-sized per-TC VMEM)


def _gelu_tanh(h):
    # tanh-approx GELU (matches the PyTorch module's static gelu), f32 math.
    return 0.5 * h * (1.0 + jnp.tanh(_GELU_C * (h + 0.044715 * h * h * h)))


# --------------------------------------------------------------------------
# Kernels (specialized at trace time on the k-extent / output dtype).
# --------------------------------------------------------------------------
def _ffn_kernel_single_k(x_ref, w1_ref, b1_ref, w2_ref, b2_ref, o_ref):
    # Whole hidden dim in one tile: no accumulator, direct lane-dense store.
    h = jnp.dot(x_ref[...], w1_ref[...], preferred_element_type=jnp.float32)
    h = _gelu_tanh(h + b1_ref[...])
    # TODO(synk): training-mode dropout (inverted PRNG mask via pltpu.prng_seed /
    # pltpu.prng_random_bits) is not implemented; eval mode = identity.
    y = jnp.dot(h.astype(w2_ref.dtype), w2_ref[...],
                preferred_element_type=jnp.float32)
    o_ref[...] = (y + b2_ref[...]).astype(o_ref.dtype)


def _ffn_kernel_acc_in_out(x_ref, w1_ref, b1_ref, w2_ref, b2_ref, o_ref):
    # f32 output block is resident across the k axis -> accumulate in place.
    k = pl.program_id(1)

    @pl.when(k == 0)
    def _():
        o_ref[...] = jnp.broadcast_to(b2_ref[...], o_ref.shape)

    h = jnp.dot(x_ref[...], w1_ref[...], preferred_element_type=jnp.float32)
    h = _gelu_tanh(h + b1_ref[...])
    o_ref[...] += jnp.dot(h.astype(w2_ref.dtype), w2_ref[...],
                          preferred_element_type=jnp.float32)


def _ffn_kernel_acc_scratch(x_ref, w1_ref, b1_ref, w2_ref, b2_ref, o_ref, acc_ref):
    # Narrow output dtype: accumulate in an f32 scratch, cast once at the end.
    k = pl.program_id(1)

    @pl.when(k == 0)
    def _():
        acc_ref[...] = jnp.broadcast_to(b2_ref[...], acc_ref.shape)

    h = jnp.dot(x_ref[...], w1_ref[...], preferred_element_type=jnp.float32)
    h = _gelu_tanh(h + b1_ref[...])
    acc_ref[...] += jnp.dot(h.astype(w2_ref.dtype), w2_ref[...],
                            preferred_element_type=jnp.float32)

    @pl.when(k == pl.num_programs(1) - 1)
    def _():
        o_ref[...] = acc_ref[...].astype(o_ref.dtype)


# --------------------------------------------------------------------------
# Parameter preparation (done once, outside the hot path).
# --------------------------------------------------------------------------
class FFNParams(NamedTuple):
    w1_t: jax.Array   # (D_in_p, D_mid_p)   compute dtype
    b1_r: jax.Array   # (1, D_mid_p)        f32
    w2_t: jax.Array   # (D_mid_p, D_in_p)   compute dtype
    b2_r: jax.Array   # (1, D_in_p)         f32
    d_in: int
    d_mid: int
    d_in_p: int
    d_mid_p: int
    tk: int


def prepare_feed_forward_params(w1, b1, w2, b2, *, compute_dtype=None,
                                tk_target=512):
    """Transpose/pad/cast PyTorch-layout ([out, in]) Linear weights once."""
    d_mid, d_in = w1.shape
    assert w2.shape == (d_in, d_mid)
    compute_dtype = jnp.dtype(compute_dtype or w1.dtype)
    itemsize = compute_dtype.itemsize

    vmem_budget = int(_tpu_vmem_bytes() * 0.75)

    # Lane-dense feature padding; align to 256 for large D_in so the 256x256
    # MXUs on v6e/v7x are fully fed (no-op/harmless on v5e, skipped for tiny
    # dims where padding waste would dominate).
    align = 256 if d_in >= 512 else 128
    d_in_p = _round_up(d_in, align)

    # Hidden-dim tile: largest multiple of 128 such that the two
    # double-buffered weight tiles stay under ~half the VMEM budget.
    tk_cap = (vmem_budget // 2) // max(1, 4 * d_in_p * itemsize)
    tk_cap = max(128, (tk_cap // 128) * 128)
    tk = min(tk_target, tk_cap)
    d_mid_p = _round_up(d_mid, 128)
    if d_mid_p <= tk:
        tk = d_mid_p                      # single k step
    else:
        d_mid_p = _round_up(d_mid, tk)

    # Zero padding keeps semantics: padded D_in columns hit zero W1^T rows,
    # padded D_mid columns have zero bias (gelu(0)=0) and zero W2^T rows,
    # padded output columns / rows are sliced off by the caller.
    w1_t = jnp.pad(jnp.transpose(w1),
                   ((0, d_in_p - d_in), (0, d_mid_p - d_mid))).astype(compute_dtype)
    w2_t = jnp.pad(jnp.transpose(w2),
                   ((0, d_mid_p - d_mid), (0, d_in_p - d_in))).astype(compute_dtype)
    b1_r = jnp.pad(b1.astype(jnp.float32).reshape(1, d_mid),
                   ((0, 0), (0, d_mid_p - d_mid)))
    b2_r = jnp.pad(b2.astype(jnp.float32).reshape(1, d_in),
                   ((0, 0), (0, d_in_p - d_in)))
    return FFNParams(w1_t, b1_r, w2_t, b2_r, d_in, d_mid, d_in_p, d_mid_p, tk)


# --------------------------------------------------------------------------
# Forward pass.
# --------------------------------------------------------------------------
def feed_forward(x2d, params: FFNParams, *, tm_target=None):
    """x2d: [M, D_in] -> [M, D_in]."""
    M, d_in = x2d.shape
    assert d_in == params.d_in
    d_in_p, d_mid_p, tk = params.d_in_p, params.d_mid_p, params.tk
    compute_dtype = params.w1_t.dtype
    out_dtype = x2d.dtype

    vmem_cap = _tpu_vmem_bytes()
    vmem_limit = int(vmem_cap * 0.75)          # ~96 MiB on v5e/v6e, ~48 MiB on v7x
    multi_tc = vmem_cap <= 80 * _MIB           # v7x heuristic: 64 MiB/TC, 2 TCs/chip

    if tm_target is None:
        # Bigger row tiles on 128 MiB-VMEM chips to amortize weight re-streaming.
        tm_target = 512 if vmem_cap >= 100 * _MIB else 256

    in_item = jnp.dtype(compute_dtype).itemsize
    out_item = jnp.dtype(out_dtype).itemsize

    def _row_bytes(tm):  # double-buffered x + out tiles + f32 acc worst case
        return tm * d_in_p * (2 * in_item + 2 * out_item + 4)

    while tm_target > 128 and _row_bytes(tm_target) > vmem_limit // 4:
        tm_target //= 2

    M_p = _round_up(M, 8)
    if M_p <= tm_target:
        if multi_tc and M_p >= 16:
            # Keep >=2 row tiles so both v7x TensorCores get work.
            tm = _round_up(_cdiv(M_p, 2), 8)
            M_p = _round_up(M_p, tm)
        else:
            tm = M_p
    else:
        tm = tm_target
        M_p = _round_up(M, tm)

    num_k = d_mid_p // tk

    x_p = jnp.pad(x2d, ((0, M_p - M), (0, d_in_p - d_in))).astype(compute_dtype)

    if num_k == 1:
        kernel = _ffn_kernel_single_k
        scratch = []
    elif jnp.dtype(out_dtype) == jnp.dtype(jnp.float32):
        kernel = _ffn_kernel_acc_in_out
        scratch = []
    else:
        kernel = _ffn_kernel_acc_scratch
        scratch = [pltpu.VMEM((tm, d_in_p), jnp.float32)]

    grid = (M_p // tm, num_k)

    y_p = pl.pallas_call(
        kernel,
        out_shape=jax.ShapeDtypeStruct((M_p, d_in_p), out_dtype),
        grid_spec=pltpu.PrefetchScalarGridSpec(
            num_scalar_prefetch=0,
            grid=grid,
            in_specs=[
                pl.BlockSpec((tm, d_in_p), lambda i, k: (i, 0)),   # x row tile
                pl.BlockSpec((d_in_p, tk), lambda i, k: (0, k)),   # W1^T k-tile
                pl.BlockSpec((1, tk), lambda i, k: (0, k)),        # b1 k-tile
                pl.BlockSpec((tk, d_in_p), lambda i, k: (k, 0)),   # W2^T k-tile
                pl.BlockSpec((1, d_in_p), lambda i, k: (0, 0)),    # b2
            ],
            out_specs=pl.BlockSpec((tm, d_in_p), lambda i, k: (i, 0)),
            scratch_shapes=scratch,
        ),
        compiler_params=pltpu.CompilerParams(
            dimension_semantics=("parallel", "arbitrary"),
            vmem_limit_bytes=vmem_limit,
        ),
    )(x_p, params.w1_t, params.b1_r, params.w2_t, params.b2_r)

    return y_p[:M, :d_in]


def feed_forward_module(x, params: FFNParams):
    """x: [..., in_features]; returns same shape."""
    lead = x.shape[:-1]
    x2d = x.reshape(-1, x.shape[-1])
    y2d = feed_forward(x2d, params)
    return y2d.reshape(*lead, x.shape[-1])


def _reference(x, w1, b1, w2, b2):
    h = x.astype(jnp.float32) @ w1.T.astype(jnp.float32) + b1
    h = 0.5 * h * (1.0 + jnp.tanh(_GELU_C * (h + 0.044715 * h ** 3)))
    return h @ w2.T.astype(jnp.float32) + b2


if __name__ == "__main__":
    # Module config: in_features=32, middle_features=64, dropout=0.1 (identity at eval)
    in_features, middle_features = 32, 64
    batch, seq = 2, 8

    key = jax.random.PRNGKey(0)
    k_x, k_w1, k_b1, k_w2, k_b2 = jax.random.split(key, 5)

    x = jax.random.normal(k_x, (batch, seq, in_features), dtype=jnp.float32)

    # nn.init.normal_(weight, std=0.02); biases keep nn.Linear default uniform init.
    w1 = 0.02 * jax.random.normal(k_w1, (middle_features, in_features), dtype=jnp.float32)
    b1 = jax.random.uniform(k_b1, (middle_features,), dtype=jnp.float32,
                            minval=-1.0 / math.sqrt(in_features),
                            maxval=1.0 / math.sqrt(in_features))
    w2 = 0.02 * jax.random.normal(k_w2, (in_features, middle_features), dtype=jnp.float32)
    b2 = jax.random.uniform(k_b2, (in_features,), dtype=jnp.float32,
                            minval=-1.0 / math.sqrt(middle_features),
                            maxval=1.0 / math.sqrt(middle_features))

    # Weights prepared once (transpose/pad/cast); f32 compute keeps the 1e-4
    # reference check tight.  For speed on large widths, pass
    # compute_dtype=jnp.bfloat16 here (f32 accumulation is retained).
    params = prepare_feed_forward_params(w1, b1, w2, b2)

    out = feed_forward_module(x, params)
    out = jax.block_until_ready(out)

    ref = _reference(x.reshape(-1, in_features), w1, b1, w2, b2).reshape(x.shape)
    assert out.shape == x.shape
    assert jnp.max(jnp.abs(out - ref)) < 1e-4, "mismatch vs reference"

    print("KERNEL_OK")
</pallas_src>

<mosaic_0001>
module attributes {stable_mosaic.version = 11 : i64} {
  func.func @_ffn_kernel_single_k(%arg0: i32, %arg1: i32, %arg2: memref<8x128xf32, #tpu.memory_space<vmem>>, %arg3: memref<128x128xf32, #tpu.memory_space<vmem>>, %arg4: memref<1x128xf32, #tpu.memory_space<vmem>>, %arg5: memref<128x128xf32, #tpu.memory_space<vmem>>, %arg6: memref<1x128xf32, #tpu.memory_space<vmem>>, %arg7: memref<8x128xf32, #tpu.memory_space<vmem>>) attributes {dimension_semantics = [#tpu.dimension_semantics<parallel>, #tpu.dimension_semantics<arbitrary>], iteration_bounds = array<i64: 2, 1>, scalar_prefetch = 0 : i64, scratch_operands = 0 : i64, tpu.core_type = #tpu.core_type<tc>, window_params = [{transform_indices = @transform_0, window_bounds = array<i64: 8, 128>}, {transform_indices = @transform_1, window_bounds = array<i64: 128, 128>}, {transform_indices = @transform_2, window_bounds = array<i64: 1, 128>}, {transform_indices = @transform_3, window_bounds = array<i64: 128, 128>}, {pipeline_mode = #tpu.pipeline_mode<synchronous>, transform_indices = @transform_4, window_bounds = array<i64: 1, 128>}, {transform_indices = @transform_5, window_bounds = array<i64: 8, 128>}]} {
    %c0 = arith.constant 0 : index
    %c0_0 = arith.constant 0 : index
    %0 = vector.load %arg2[%c0, %c0_0] : memref<8x128xf32, #tpu.memory_space<vmem>>, vector<8x128xf32>
    %c0_1 = arith.constant 0 : index
    %c0_2 = arith.constant 0 : index
    %1 = vector.load %arg3[%c0_1, %c0_2] : memref<128x128xf32, #tpu.memory_space<vmem>>, vector<128x128xf32>
    %cst = arith.constant dense<0.000000e+00> : vector<8x128xf32>
    %2 = tpu.matmul %0, %1, %cst {dimension_numbers = #tpu.dot_dimension_numbers<[1], [0], [0], [1], [0, 0, 1, 1], [], []>} : vector<8x128xf32>, vector<128x128xf32>, vector<8x128xf32> -> vector<8x128xf32>
    %c0_3 = arith.constant 0 : index
    %c0_4 = arith.constant 0 : index
    %3 = vector.load %arg4[%c0_3, %c0_4] : memref<1x128xf32, #tpu.memory_space<vmem>>, vector<1x128xf32>
    %4 = vector.broadcast %3 : vector<1x128xf32> to vector<8x128xf32>
    %5 = arith.addf %2, %4 : vector<8x128xf32>
    %cst_5 = arith.constant 5.000000e-01 : f32
    %6 = vector.broadcast %cst_5 : f32 to vector<8x128xf32>
    %7 = arith.mulf %6, %5 : vector<8x128xf32>
    %cst_6 = arith.constant 4.471500e-02 : f32
    %8 = vector.broadcast %cst_6 : f32 to vector<8x128xf32>
    %9 = arith.mulf %8, %5 : vector<8x128xf32>
    %10 = arith.mulf %9, %5 : vector<8x128xf32>
    %11 = arith.mulf %10, %5 : vector<8x128xf32>
    %12 = arith.addf %5, %11 : vector<8x128xf32>
    %cst_7 = arith.constant 0.797884583 : f32
    %13 = vector.broadcast %cst_7 : f32 to vector<8x128xf32>
    %14 = arith.mulf %13, %12 : vector<8x128xf32>
    %15 = math.tanh %14 : vector<8x128xf32>
    %cst_8 = arith.constant 1.000000e+00 : f32
    %16 = vector.broadcast %cst_8 : f32 to vector<8x128xf32>
    %17 = arith.addf %16, %15 : vector<8x128xf32>
    %18 = arith.mulf %7, %17 : vector<8x128xf32>
    %c0_9 = arith.constant 0 : index
    %c0_10 = arith.constant 0 : index
    %19 = vector.load %arg5[%c0_9, %c0_10] : memref<128x128xf32, #tpu.memory_space<vmem>>, vector<128x128xf32>
    %cst_11 = arith.constant dense<0.000000e+00> : vector<8x128xf32>
    %20 = tpu.matmul %18, %19, %cst_11 {dimension_numbers = #tpu.dot_dimension_numbers<[1], [0], [0], [1], [0, 0, 1, 1], [], []>} : vector<8x128xf32>, vector<128x128xf32>, vector<8x128xf32> -> vector<8x128xf32>
    %c0_12 = arith.constant 0 : index
    %c0_13 = arith.constant 0 : index
    %21 = vector.load %arg6[%c0_12, %c0_13] : memref<1x128xf32, #tpu.memory_space<vmem>>, vector<1x128xf32>
    %22 = vector.broadcast %21 : vector<1x128xf32> to vector<8x128xf32>
    %23 = arith.addf %20, %22 : vector<8x128xf32>
    %c0_14 = arith.constant 0 : index
    %c0_15 = arith.constant 0 : index
    %24 = vector.load %arg7[%c0_14, %c0_15] : memref<8x128xf32, #tpu.memory_space<vmem>>, vector<8x128xf32>
    tpu.vector_store %arg7[%c0_14, %c0_15], %23 {strides = array<i32>} : memref<8x128xf32, #tpu.memory_space<vmem>>, vector<8x128xf32>,
    return
  }
  func.func @transform_0(%arg0: i32, %arg1: i32) -> (i32, i32) {
    %c0_i32 = arith.constant 0 : i32
    %c0_i32_0 = arith.constant 0 : i32
    return %arg0, %c0_i32 : i32, i32
  }
  func.func @transform_1(%arg0: i32, %arg1: i32) -> (i32, i32) {
    %c0_i32 = arith.constant 0 : i32
    %c0_i32_0 = arith.constant 0 : i32
    return %c0_i32, %arg1 : i32, i32
  }
  func.func @transform_2(%arg0: i32, %arg1: i32) -> (i32, i32) {
    %c0_i32 = arith.constant 0 : i32
    %c0_i32_0 = arith.constant 0 : i32
    return %c0_i32, %arg1 : i32, i32
  }
  func.func @transform_3(%arg0: i32, %arg1: i32) -> (i32, i32) {
    %c0_i32 = arith.constant 0 : i32
    %c0_i32_0 = arith.constant 0 : i32
    return %arg1, %c0_i32 : i32, i32
  }
  func.func @transform_4(%arg0: i32, %arg1: i32) -> (i32, i32) {
    %c0_i32 = arith.constant 0 : i32
    %c0_i32_0 = arith.constant 0 : i32
    %c0_i32_1 = arith.constant 0 : i32
    return %c0_i32, %c0_i32_0 : i32, i32
  }
  func.func @transform_5(%arg0: i32, %arg1: i32) -> (i32, i32) {
    %c0_i32 = arith.constant 0 : i32
    %c0_i32_0 = arith.constant 0 : i32
    return %arg0, %c0_i32 : i32, i32
  }
}

</mosaic_0001>

<bundles_post_ra>
// kernel: tpu_custom_call.1
= control target key start
LH: loop header
LB: loop body
LE: loop exit
PB: predicated region body
PF: predicated region fallthrough
CT: control target
= control target key end

     0   :  { %s1279_s0 = inlined_call_operand.hbm [shape: f32[16,128], index: 0, kind: input, shape index: {}]   ;;  %s1280_s1 = inlined_call_operand.hbm [shape: f32[128,128], index: 1, kind: input, shape index: {}]   ;;  %s1281_s2 = inlined_call_operand.vmem [shape: f32[1,128], index: 2, kind: input, shape index: {}]   ;;  %s1282_s3 = inlined_call_operand.hbm [shape: f32[128,128], index: 3, kind: input, shape index: {}]   ;;  %s1283_s4 = inlined_call_operand.vmem [shape: f32[1,128], index: 4, kind: input, shape index: {}]   ;;  %s1284_s5 = inlined_call_operand.hbm [shape: f32[16,128], index: 5, kind: output, shape index: {}]  }
   0x1   :  { %1288 = sst [smem:[#allocation12_spill]] %s1280_s1 }
   0x2   :  { %10 = vsyncpa [#allocation3], 0 }
   0x3   :  { %12 = vsyncpa [#allocation3 + $0x1], 0 }
   0x4   :  { %13 = vsyncpa [#allocation6], 0 }
   0x5   :  { %14 = vsyncpa [#allocation4], 0 }
   0x6   :  { %16 = vsyncpa [#allocation4 + $0x1], 0  ;;  %s1052_s18 = smov 0   ;;  %s1054_s19 = smov 0  }
   0x7   :  { %s1056_s20 = smov 0   ;;  %s1058_s21 = smov 0  }
   0x8   :  { %s1060_s22 = smov 0   ;;  %s1062_s23 = smov 0  }
   0x9 LB: > { %s635_s24 = sadd.s32 4294967295, %s1012_s23   ;;  %s636_s25 = sadd.s32 4294967294, %s1012_s23   ;;  %s1012_s23 = sphi %s1062_s23, %s22_s23   ;;  %s1008_s22 = sphi %s1060_s22, %s1306_s22   ;;  %s1004_s21 = sphi %s1058_s21, %s1305_s21   ;;  %s1000_s20 = sphi %s1056_s20, %s1304_s20   ;;  %s996_s19 = sphi %s1054_s19, %s1303_s19   ;;  %s992_s18 = sphi %s1052_s18, %s1302_s18  }
   0xa   : > { %p54_p0 = scmp.ne.s32.totalorder %s996_s19, %s992_s18  ;;  %p1086_p1 = scmp.eq.s32.totalorder %s635_s24, 0 }
   0xb   : > { %p1090_p2 = scmp.eq.s32.totalorder %s635_s24, 1  ;;  %p183_p3 = scmp.eq.s32.totalorder %s636_s25, 1 }
   0xc   : > { %s1289_s26 = scalar_select %p1086_p1, 1, 0 }
   0xd   : > { %p1096_p4 = por %p1086_p1, %p54_p0  ;;  %p637_p5 = scmp.ge.s32.totalorder %s1012_s23, 1 }
   0xe   : > { %p1101_p6 = por %p183_p3, %p54_p0  ;;  %p190_p7 = scmp.lt.s32.totalorder %s1012_s23, 3 }
   0xf   : > { %s1291_s28 = scalar_select %p1096_p4, 1, 0 }
  0x10   : > { %s1292_s29 = scalar_select %p1101_p6, 1, 0 }
  0x11   : > { %p1106_p8 = pnand %p637_p5, %p190_p7  ;;  %s1014_s6 = smov [#allocation5]  }
  0x12   : > { %s204_s7 = sshll.u32 %s1014_s6, 4  ;;  %s1015_s9 = smov [#allocation7]   ;;  %s205_s7 = int_to_ptr.vmem [resolvable:$true] %s204_s7 }
  0x13   : > { %p771_p9 = pneg %p1106_p8  ;;  %s226_s10 = sshll.u32 %s1015_s9, 4  ;;  %s227_s10 = int_to_ptr.vmem [resolvable:$true] %s226_s10 }
  0x14   : > { %s859_s11 = scalar_lea.vmem %s205_s7, 2048  ;;  %p867_p5 = scmp.lt.s32.totalorder %s205_s7, %s205_s7 }
  0x15   : > { %p1115_p11 = pnand %p771_p9, %p1086_p1  ;;  %p860_p13 = scmp.ne.s32.totalorder %s205_s7, %s859_s11 }
  0x16   : > { %p868_p7 = scmp.lt.s32.totalorder %s859_s11, %s859_s11 }
  0x17   : > { %p850_p12 = pneg %p1115_p11 }
  0x18   : > { %p869_p10 = por %p868_p7, %p867_p5 }
  0x19   : > { %p862_p0 = pnand %p860_p13, %p850_p12 }
  0x1b   : > { %p863_p3 = pneg %p862_p0 }
  0x1d   : > { %p870_p9 = pnand %p869_p10, %p863_p3 }
  0x1f   : > { %873 = shalt.err (!%p870_p9)
}
  0x20   : > { %s1016_s12 = smov 128   ;;  %s1017_s13 = smov 8  }
  0x21   : > { %s1295_s1 = sld [smem:[#allocation12_spill]]  ;;  %s885_s16 = scalar_lea.vmem %s227_s10, 2048 }
  0x22   : > { %p886_p6 = scmp.ne.s32.totalorder %s227_s10, %s885_s16  ;;  %p893_p1 = scmp.lt.s32.totalorder %s227_s10, %s227_s10 }
  0x23   : > { %p894_p4 = scmp.lt.s32.totalorder %s885_s16, %s885_s16 }
  0x24   : > { %p888_p13 = pnand %p886_p6, %p850_p12 }
  0x25   : > { %p895_p5 = por %p894_p4, %p893_p1 }
  0x26   : > { %p889_p0 = pneg %p888_p13 }
  0x27   : > { %774 = dma.hbm_to_vmem [thread:$0]  (!%p1115_p11), %s1295_s1, 2048, %s205_s7, [#allocation6], %s1016_s12, %s1016_s12, %s1017_s13  }
  0x28   : > { %p896_p10 = pnand %p895_p5, %p889_p0 }
  0x2a   : > { %899 = shalt.err (!%p896_p10)
}
  0x2b   : > { %777 = dma.hbm_to_vmem [thread:$0]  (!%p1115_p11), %s1282_s3, 2048, %s227_s10, [#allocation6], %s1016_s12, %s1016_s12, %s1017_s13  }
  0x2c   : > { %s34_s25 = sadd.s32 1, %s1008_s22  ;;  %s41_s6 = sadd.s32 1, %s1000_s20 }
  0x2d   : > { %p36_p1 = scmp.ge.s32.totalorder %s34_s25, 2  ;;  %p48_p4 = scmp.ne.s32.totalorder %s1000_s20, %s996_s19 }
  0x2e   : > { %p49_p6 = scmp.eq.s32.totalorder %s1012_s23, 0  ;;  %p788_p12 = scmp.lt.s32.totalorder %s1012_s23, 2 }
  0x2f   : > { %s1308_s25 = smov (%p36_p1, %s34_s25), 0  ;;  %p1147_p7 = por %p1090_p2, %p48_p4 }
  0x30   : > { %p50_p3 = por %p49_p6, %p48_p4  ;;  %s38_s8 = ssub.s32 %s1008_s22, %s1308_s25 }
  0x31   : > { %s243_s9 = sand.u32 1, %s1000_s20   ;;  %p39_p9 = scmp.eq.s32.totalorder %s38_s8, 0 }
  0x32   : > { %s642_s10 = sshll.u32 %s243_s9, 3  ;;  %s643_s11 = sshll.u32 %s1008_s22, 7 }
  0x33   : > { %s1156_s12 = scalar_select %p39_p9, %s1000_s20, %s41_s6  }
  0x34   : > { %s252_s15 = scalar_lea.hbm %s1279_s0, %s643_s11  ;;  %s247_s16 = scalar_lea.vmem [#allocation2], %s642_s10 }
  0x35   : > { %s254_s17 = sshll.u32 %s247_s16, 4  ;;  %p1163_p11 = pnand %p788_p12, %p50_p3  ;;  %s255_s17 = int_to_ptr.vmem [resolvable:$true] %s254_s17 }
  0x36   : > { %s244_s24 = scalar_lea.sflag [#allocation3], %s243_s9  ;;  %s913_s8 = scalar_lea.vmem %s255_s17, 128 }
  0x37   : > { %p902_p2 = pneg %p1163_p11  ;;  %p914_p13 = scmp.ne.s32.totalorder %s255_s17, %s913_s8 }
  0x38   : > { %s1018_s6 = smov [#allocation2]  }
  0x39   : > { %p916_p0 = pnand %p914_p13, %p902_p2  ;;  %s918_s1 = sshll.u32 %s1018_s6, 4  ;;  %s919_s1 = int_to_ptr.vmem [resolvable:$false] %s918_s1 }
  0x3a   : > { %s920_s11 = scalar_lea.vmem %s919_s1, 256  ;;  %p921_p10 = scmp.lt.s32.totalorder %s255_s17, %s919_s1 }
  0x3b   : > { %p917_p5 = pneg %p916_p0  ;;  %p922_p1 = scmp.lt.s32.totalorder %s920_s11, %s913_s8 }
  0x3d   : > { %p923_p4 = por %p922_p1, %p921_p10 }
  0x3f   : > { %p924_p6 = pnand %p923_p4, %p917_p5 }
  0x41   : > { %927 = shalt.err (!%p924_p6)
}
  0x42   : > { %781 = dma.hbm_to_vmem [thread:$0]  (!%p1163_p11), %s252_s15, 128, %s255_s17, %s244_s24  }
  0x43   : > { %263 = sbr.rel (%p1106_p8) target bundleno = 541 (0x21d), region = 40  ;;  %s1174_s9 = sand.u32 (!%p1106_p8), 1, %s996_s19  }
  0x44   : > { %s645_s10 = sshll.u32 (!%p1106_p8), %s1174_s9, 3  ;;  %s266_s13 = scalar_lea.sflag (!%p1106_p8), [#allocation3], %s1174_s9 }
  0x45   : > { %s1180_s1 = scalar_lea.vmem (!%p1106_p8), [#allocation2], %s645_s10  ;;  %p1298_p12 = scmp.ne.s32.totalorder (!%p1106_p8), %s1291_s28, 0 }
  0x48   : > { %979 = dma.done.wait (%p1298_p12), %s266_s13, 128  }
  0x49   : > { %981 = vsyncadd (%p1298_p12), %s266_s13, 4294967168  ;;  %p1299_p3 = scmp.ne.s32.totalorder %s1289_s26, 0 }
  0x4b   : > { %983 = dma.done.wait (%p1299_p3), [#allocation6], 4096  }
  0x4c   : > { %985 = vsyncadd (%p1299_p3), [#allocation6], 4294963200  ;;  %v1019_v0 = vmov 0.0   ;;  %vm1020_vm0 = vmmov 0   ;;  %v327_v1 = vld [vmem:[#allocation5 + $0x78] sm:$0xff]  ;;  %v326_v2 = vld [vmem:[#allocation5 + $0x70] sm:$0xff] }
  0x4d   : > { %689 = vmatprep.subr.mxu0 %v1019_v0  ;;  %721 = vmatprep.mubr.msk.f32.mxu0 %vm1020_vm0, %v1019_v0  ;;  %v325_v3 = vld [vmem:[#allocation5 + $0x68] sm:$0xff]  ;;  %v324_v4 = vld [vmem:[#allocation5 + $0x60] sm:$0xff]  ;;  %v323_v5 = vld [vmem:[#allocation5 + $0x58] sm:$0xff]  ;;  %s652_s15 = sshll.u32 %s1004_s21, 7  ;;  %s306_s16 = scalar_lea.vmem [#allocation8], %s645_s10 }
  0x4e   : > { %724 = vmatprep.subr.mxu1 %v1019_v0  ;;  %756 = vmatprep.mubr.msk.f32.mxu1 %vm1020_vm0, %v1019_v0  ;;  %v322_v6 = vld [vmem:[#allocation5 + $0x50] sm:$0xff]  ;;  %v321_v7 = vld [vmem:[#allocation5 + $0x48] sm:$0xff]  ;;  %v320_v8 = vld [vmem:[#allocation5 + $0x40] sm:$0xff]  ;;  %s522_s17 = sshll.u32 %s306_s16, 4  ;;  %s1237_s8 = scalar_lea.hbm %s1284_s5, %s652_s15  ;;  %s523_s17 = int_to_ptr.vmem [resolvable:$true] %s522_s17 }
  0x4f   : > { %690 = vmatpush3.msra.mxu0 %v327_v1  ;;  %v319_v9 = vld [vmem:[#allocation5 + $0x38] sm:$0xff]  ;;  %v318_v10 = vld [vmem:[#allocation5 + $0x30] sm:$0xff]  ;;  %v317_v11 = vld [vmem:[#allocation5 + $0x28] sm:$0xff]  ;;  %s509_s6 = scalar_lea.sflag [#allocation4], %s1174_s9  ;;  %s928_s11 = scalar_lea.vmem %s523_s17, 128 }
  0x50   : > { %691 = vmatprep.subr.mxu0 %v1019_v0  ;;  %v316_v12 = vld [vmem:[#allocation5 + $0x20] sm:$0xff]  ;;  %v315_v13 = vld [vmem:[#allocation5 + $0x18] sm:$0xff]  ;;  %v314_v14 = vld [vmem:[#allocation5 + $0x10] sm:$0xff]  ;;  %p929_p8 = scmp.ne.s32.totalorder %s523_s17, %s928_s11  ;;  %s1021_s21 = smov [#allocation8]  }
  0x51   : > { %692 = vmatpush3.msra.mxu0 %v326_v2  ;;  %v313_v15 = vld [vmem:[#allocation5 + $0x8] sm:$0xff]  ;;  %v312_v16 = vld [vmem:[#allocation5] sm:$0xff]  ;;  %v311_v17 = vld [vmem:[%s1180_s1] sm:$0xff]  ;;  %s932_s13 = sshll.u32 %s1021_s21, 4  ;;  %s933_s13 = int_to_ptr.vmem [resolvable:$false] %s932_s13 }
  0x52   : > { %693 = vmatprep.subr.mxu0 %v1019_v0  ;;  %v429_v18 = vld [vmem:[#allocation7 + $0x78] sm:$0xff]  ;;  %v428_v19 = vld [vmem:[#allocation7 + $0x70] sm:$0xff]  ;;  %v427_v20 = vld [vmem:[#allocation7 + $0x68] sm:$0xff]  ;;  %p930_p9 = pnand %p929_p8, %p1147_p7  ;;  %s934_s10 = scalar_lea.vmem %s933_s13, 256 }
  0x53   : > { %694 = vmatpush3.msra.mxu0 %v325_v3  ;;  %725 = vmatpush3.msra.mxu1 %v429_v18  ;;  %v426_v21 = vld [vmem:[#allocation7 + $0x60] sm:$0xff]  ;;  %v425_v22 = vld [vmem:[#allocation7 + $0x58] sm:$0xff]  ;;  %v424_v23 = vld [vmem:[#allocation7 + $0x50] sm:$0xff]  ;;  %p935_p2 = scmp.lt.s32.totalorder %s523_s17, %s933_s13  ;;  %p936_p13 = scmp.lt.s32.totalorder %s934_s10, %s928_s11 }
  0x54   : > { %695 = vmatprep.subr.mxu0 %v1019_v0  ;;  %726 = vmatprep.subr.mxu1 %v1019_v0  ;;  %v423_v24 = vld [vmem:[#allocation7 + $0x48] sm:$0xff]  ;;  %v422_v25 = vld [vmem:[#allocation7 + $0x40] sm:$0xff]  ;;  %v421_v26 = vld [vmem:[#allocation7 + $0x38] sm:$0xff]  ;;  %p931_p11 = pneg %p930_p9 }
  0x55   : > { %696 = vmatpush3.msra.mxu0 %v324_v4  ;;  %727 = vmatpush3.msra.mxu1 %v428_v19  ;;  %v420_v27 = vld [vmem:[#allocation7 + $0x30] sm:$0xff]  ;;  %v419_v28 = vld [vmem:[#allocation7 + $0x28] sm:$0xff]  ;;  %v418_v29 = vld [vmem:[#allocation7 + $0x20] sm:$0xff]  ;;  %p937_p0 = por %p936_p13, %p935_p2 }
  0x56   : > { %697 = vmatprep.subr.mxu0 %v1019_v0  ;;  %728 = vmatprep.subr.mxu1 %v1019_v0  ;;  %v417_v30 = vld [vmem:[#allocation7 + $0x18] sm:$0xff]  ;;  %v416_v31 = vld [vmem:[#allocation7 + $0x10] sm:$0xff]  ;;  %v415_v32 = vld [vmem:[#allocation7 + $0x8] sm:$0xff] }
  0x57   : > { %698 = vmatpush3.msra.mxu0 %v323_v5  ;;  %729 = vmatpush3.msra.mxu1 %v427_v20  ;;  %v414_v33 = vld [vmem:[#allocation7] sm:$0xff]  ;;  %v649_v34 = vld [vmem:[%s1281_s2] ss:$0 sm:$0xff]  ;;  %p938_p5 = pnand %p937_p0, %p931_p11 }
  0x58   : > { %699 = vmatprep.subr.mxu0 %v1019_v0  ;;  %730 = vmatprep.subr.mxu1 %v1019_v0  ;;  %v650_v47 = vld [vmem:[%s1283_s4] ss:$0 sm:$0xff] }
  0x59   : > { %700 = vmatpush3.msra.mxu0 %v322_v6  ;;  %731 = vmatpush3.msra.mxu1 %v426_v21 }
  0x5a   : > { %701 = vmatprep.subr.mxu0 %v1019_v0  ;;  %732 = vmatprep.subr.mxu1 %v1019_v0 }
  0x5b   : > { %702 = vmatpush3.msra.mxu0 %v321_v7  ;;  %733 = vmatpush3.msra.mxu1 %v425_v22 }
  0x5c   : > { %703 = vmatprep.subr.mxu0 %v1019_v0  ;;  %734 = vmatprep.subr.mxu1 %v1019_v0 }
  0x5d   : > { %704 = vmatpush3.msra.mxu0 %v320_v8  ;;  %735 = vmatpush3.msra.mxu1 %v424_v23 }
  0x5e   : > { %705 = vmatprep.subr.mxu0 %v1019_v0  ;;  %736 = vmatprep.subr.mxu1 %v1019_v0 }
  0x5f   : > { %706 = vmatpush3.msra.mxu0 %v319_v9  ;;  %737 = vmatpush3.msra.mxu1 %v423_v24 }
  0x60   : > { %707 = vmatprep.subr.mxu0 %v1019_v0  ;;  %738 = vmatprep.subr.mxu1 %v1019_v0 }
  0x61   : > { %708 = vmatpush3.msra.mxu0 %v318_v10  ;;  %739 = vmatpush3.msra.mxu1 %v422_v25 }
  0x62   : > { %709 = vmatprep.subr.mxu0 %v1019_v0  ;;  %740 = vmatprep.subr.mxu1 %v1019_v0 }
  0x63   : > { %710 = vmatpush3.msra.mxu0 %v317_v11  ;;  %741 = vmatpush3.msra.mxu1 %v421_v26 }
  0x64   : > { %711 = vmatprep.subr.mxu0 %v1019_v0  ;;  %742 = vmatprep.subr.mxu1 %v1019_v0 }
  0x65   : > { %712 = vmatpush3.msra.mxu0 %v316_v12  ;;  %743 = vmatpush3.msra.mxu1 %v420_v27 }
  0x66   : > { %713 = vmatprep.subr.mxu0 %v1019_v0  ;;  %744 = vmatprep.subr.mxu1 %v1019_v0 }
  0x67   : > { %714 = vmatpush3.msra.mxu0 %v315_v13  ;;  %745 = vmatpush3.msra.mxu1 %v419_v28 }
  0x68   : > { %715 = vmatprep.subr.mxu0 %v1019_v0  ;;  %746 = vmatprep.subr.mxu1 %v1019_v0 }
  0x69   : > { %716 = vmatpush3.msra.mxu0 %v314_v14  ;;  %747 = vmatpush3.msra.mxu1 %v418_v29 }
  0x6a   : > { %717 = vmatprep.subr.mxu0 %v1019_v0  ;;  %748 = vmatprep.subr.mxu1 %v1019_v0 }
  0x6b   : > { %718 = vmatpush3.msra.mxu0 %v313_v15  ;;  %749 = vmatpush3.msra.mxu1 %v417_v30 }
  0x6c   : > { %719 = vmatprep.subr.mxu0 %v1019_v0  ;;  %750 = vmatprep.subr.mxu1 %v1019_v0 }
  0x6d   : > { %720 = vmatpush3.msra.mxu0 %v312_v16  ;;  %751 = vmatpush3.msra.mxu1 %v416_v31 }
  0x6e   : > { %722 = vmatmul.mubr.f32.vlgmr.msra.gmra.mxu0 %v311_v17  ;;  %752 = vmatprep.subr.mxu1 %v1019_v0 }
  0x6f   : > { %753 = vmatpush3.msra.mxu1 %v415_v32 }
  0x70   : > { %754 = vmatprep.subr.mxu1 %v1019_v0 }
  0x71   : > { %755 = vmatpush3.msra.mxu1 %v414_v33 }
 0x12e   : > { %v401_v35 = vpop.f32.mrf.mxu0 }
 0x12f   : > { %v402_v36 = vadd.f32 %v649_v34, %v401_v35 }
 0x130   : > { %v723_v37 = vpop.f32.mrf.mxu0 }
 0x131   : > { %v406_v38 = vmul.f32 0.044715, %v402_v36  ;;  %v405_v44 = vmul.f32 0.5, %v402_v36 }
 0x133   : > { %v407_v39 = vmul.f32 %v406_v38, %v402_v36 }
 0x135   : > { %v408_v40 = vmul.f32 %v407_v39, %v402_v36 }
 0x137   : > { %v409_v41 = vadd.f32 %v408_v40, %v402_v36 }
 0x139   : > { %v410_v42 = vmul.f32 0.7978846, %v409_v41 }
 0x13b   : > { %846 = vtanh.f32 %v410_v42 }
 0x148   : > { %v847_v43 = vpop.eup %846 }
 0x149   : > { %v412_v45 = vadd.f32 1.0, %v847_v43 }
 0x14b   : > { %v413_v46 = vmul.f32 %v412_v45, %v405_v44 }
 0x14d   : > { %757 = vmatmul.mubr.f32.vlgmr.msra.gmra.mxu1 %v413_v46 }
 0x20d   : > { %v503_v48 = vpop.f32.mrf.mxu1 }
 0x20e   : > { %v504_v49 = vadd.f32 %v650_v47, %v503_v48 }
 0x20f   : > { %v758_v50 = vpop.f32.mrf.mxu1 }
 0x210   : > { %507 = vst [vmem:[%s306_s16] sm:$0xff] %v504_v49 }
 0x211   : > { %941 = shalt.err (!%p938_p5)
}
 0x212   : > { %s942_s1 = scalar_lea.hbm %s1237_s8, 128  ;;  %s946_s28 = scalar_lea.hbm %s1284_s5, 256 }
 0x213   : > { %p943_p10 = scmp.ne.s32.totalorder %s1237_s8, %s942_s1  ;;  %p947_p6 = scmp.lt.s32.totalorder %s1237_s8, %s1284_s5 }
 0x214   : > { %p948_p12 = scmp.lt.s32.totalorder %s946_s28, %s942_s1 }
 0x215   : > { %p944_p1 = pnand %p943_p10, %p1147_p7 }
 0x216   : > { %p949_p3 = por %p948_p12, %p947_p6 }
 0x217   : > { %p945_p4 = pneg %p944_p1 }
 0x219   : > { %p950_p8 = pnand %p949_p3, %p945_p4 }
 0x21b   : > { %953 = shalt.err (!%p950_p8)
}
 0x21c   : > { %769 = dma.vmem_to_hbm [thread:$0]  (%p1147_p7), %s523_s17, 128, %s1237_s8, %s509_s6  }
 0x21d PF: > { %s534_s15 = sand.u32 1, %s992_s18   ;;  %p1300_p9 = scmp.ne.s32.totalorder %s1292_s29, 0 }
 0x21e   : > { %p1301_p11 = scmp.ge.s32.totalorder %s1012_s23, 2  ;;  %s535_s16 = scalar_lea.sflag [#allocation4], %s534_s15 }
 0x220   : > { %p783_p2 = pnand %p1301_p11, %p1300_p9 }
 0x222   : > { %p784_p13 = pneg %p783_p2 }
 0x224   : > { %987 = dma.done.wait (%p784_p13), %s535_s16, 128  }
 0x225   : > { %989 = vsyncadd (%p784_p13), %s535_s16, 4294967168  ;;  %s22_s23 = sadd.s32 1, %s1012_s23   ;;  %s1302_s18 = smov %s996_s19 }
 0x226   : > { %p19_p0 = scmp.ge.s32.totalorder %s22_s23, 4   ;;  %s1303_s19 = smov %s1000_s20 }
 0x227   : > { %s1304_s20 = smov %s1156_s12  ;;  %s1305_s21 = smov %s1008_s22 }
 0x228   : > { %s1306_s22 = smov %s1308_s25  ;;  %21 = sbr.rel (!%p19_p0) target bundleno = 9 (0x9), region = 98 }
 0x22d   :  { %540 = vsyncpa [#allocation3], 1 }
 0x22e   :  { %542 = vsyncpa [#allocation3 + $0x1], 1 }
 0x22f   :  { %543 = vsyncpa [#allocation6], 1 }
 0x230   :  { %544 = vsyncpa [#allocation4], 1 }
 0x231   :  { %546 = vsyncpa [#allocation4 + $0x1], 1 }

</bundles_post_ra>
